<compile_context>
chip_gen: v7x
topology: tpu7x:2x2x1
jax: 0.10.0
libtpu: 0.0.40
codegen_flags: <defaults>
</compile_context>

<pallas_src>
import numpy as np

import jax
import jax.numpy as jnp
from jax import lax
from jax.experimental import pallas as pl
from jax.experimental.pallas import tpu as pltpu


_EPS = 1e-12  # clamp on colsum(P); reference would produce inf/NaN for an empty cluster.


# --------------------------------------------------------------------------
# Tile / VMEM sizing (generation aware)
# --------------------------------------------------------------------------
def _vmem_capacity_bytes():
    try:
        return int(pltpu.get_tpu_info().vmem_capacity_bytes)
    except Exception:
        return 64 << 20  # conservative fallback (v7x per-TensorCore VMEM)


def _derive_block_n(N, d, k1, itemsize, requested=None):
    """Largest sublane-aligned row tile whose double-buffered inputs fit a VMEM budget."""
    sub = 16 if itemsize == 2 else 8            # bf16 packs 2 rows / sublane
    if requested is None:
        budget = _vmem_capacity_bytes() // 4     # keep double-buffered inputs <= 1/4 VMEM
        per_row = 2 * (d + k1) * itemsize        # 2x: BlockSpec double buffering
        cap = max(budget // max(per_row, 1), sub)
        cap = min(cap, 1 << 15)
    else:
        cap = max(int(requested), sub)
    if N <= cap:
        return N                                 # single full-array tile (always legal)
    return max((cap // sub) * sub, sub)          # remainder rows handled by masking


# --------------------------------------------------------------------------
# Fused kernel body (closure over static layer structure)
# --------------------------------------------------------------------------
def _make_fused_kernel(N, tn, num_layers, mask_rows):
    n_pnext = num_layers - 1

    def kernel(*refs):
        x_ref = refs[0]                               # (tn, d)   streamed
        p1_ref = refs[1]                              # (tn, k1)  streamed
        pnext_refs = refs[2:2 + n_pnext]              # small (k_prev, k_l), resident
        wcss_ref = refs[2 + n_pnext]                  # (1, L) output
        colsum_acc, ptx_acc, q_acc = refs[3 + n_pnext:]

        step = pl.program_id(0)

        @pl.when(step == 0)
        def _init():
            colsum_acc[...] = jnp.zeros_like(colsum_acc)
            ptx_acc[...] = jnp.zeros_like(ptx_acc)
            q_acc[...] = jnp.zeros_like(q_acc)

        X = x_ref[...]
        P = p1_ref[...]
        if mask_rows:  # static: only emitted when N % tn != 0
            rows = step * tn + lax.broadcasted_iota(jnp.int32, (tn, 1), 0)
            valid = rows < N
            X = jnp.where(valid, X, 0)
            P = jnp.where(valid, P, 0)

        Pf = P.astype(jnp.float32)
        Xf = X.astype(jnp.float32)
        x2 = jnp.sum(Xf * Xf, axis=1, keepdims=True)                    # (tn, 1)

        # Streaming accumulators (f32), layer independent.
        colsum_acc[...] += jnp.sum(Pf, axis=0, keepdims=True)           # (1, k1)
        q_acc[...] += jnp.sum(Pf * x2, axis=0, keepdims=True)           # (1, k1)
        # P1^T X on the MXU (contract the row axis of both operands); f32 accumulate.
        ptx_acc[...] += lax.dot_general(P, X, (((0,), (0,)), ((), ())),
                                        preferred_element_type=jnp.float32)

        @pl.when(step == pl.num_programs(0) - 1)
        def _finalize():
            col = colsum_acc[...]                    # colsum of chained P for this layer
            m = ptx_acc[...]                         # (chained P)^T X
            t = q_acc[...]                           # sum(t) == sum_i rowmass_i ||x_i||^2
            vals = []
            for l in range(num_layers):
                if l > 0:
                    pn = pnext_refs[l - 1][...].astype(jnp.float32)     # (k_prev, k_l)
                    col = jnp.dot(col, pn, preferred_element_type=jnp.float32)
                    t = jnp.dot(t, pn, preferred_element_type=jnp.float32)
                    m = lax.dot_general(pn, m, (((0,), (0,)), ((), ())),
                                        preferred_element_type=jnp.float32)
                # TODO(synk): pl.reciprocal(..., approx=True) in prod (EUP slot).
                inv = pl.reciprocal(jnp.maximum(col, _EPS))             # (1, k_l)
                m2 = jnp.sum(m * m, axis=1, keepdims=True)              # (k_l, 1)
                term = jnp.sum(m2 * inv.T, keepdims=True)               # (1, 1)
                sx2 = jnp.sum(t, keepdims=True)                         # (1, 1)
                vals.append(jnp.maximum(sx2 - term, 0.0))
            wcss_ref[...] = jnp.concatenate(vals, axis=1)               # (1, L)

    return kernel


# --------------------------------------------------------------------------
# Wrapper: all hierarchy layers in one pallas_call
# --------------------------------------------------------------------------
def hierarchical_wcss(X, Probabilities, *, block_n=None, input_dtype=jnp.float32):
    """Returns a (L,) f32 vector of per-layer soft WCSS values (one pass over X)."""
    num_layers = len(Probabilities)
    assert num_layers >= 1
    N, d = X.shape
    k1 = Probabilities[0].shape[1]
    itemsize = int(np.dtype(input_dtype).itemsize)

    Xc = jnp.asarray(X).astype(input_dtype)
    P1 = jnp.asarray(Probabilities[0]).astype(input_dtype)
    Pnexts = [jnp.asarray(p).astype(input_dtype) for p in Probabilities[1:]]

    tn = _derive_block_n(N, d, k1, itemsize, block_n)
    grid_n = pl.cdiv(N, tn)
    mask_rows = (N % tn) != 0

    in_specs = [pl.BlockSpec((tn, d), lambda i: (i, 0)),
                pl.BlockSpec((tn, k1), lambda i: (i, 0))]
    for p in Pnexts:
        in_specs.append(pl.BlockSpec(p.shape, lambda i: (0, 0)))   # small, stays resident
    out_specs = pl.BlockSpec((1, num_layers), lambda i: (0, 0))

    scratch_shapes = [pltpu.VMEM((1, k1), jnp.float32),   # colsum(P1)
                      pltpu.VMEM((k1, d), jnp.float32),   # P1^T X
                      pltpu.VMEM((1, k1), jnp.float32)]   # P1^T ||x||^2

    # Explicit VMEM limit: actual need (double-buffered tiles + resident smalls) + margin,
    # clamped to the chip's physical capacity (v5e scoped default is only 16 MiB).
    need = 2 * tn * (d + k1) * itemsize
    need += 2 * sum(int(p.size) for p in Pnexts) * itemsize
    need += 4 * (k1 * d + 2 * k1) + (1 << 20)
    cap = _vmem_capacity_bytes()
    vmem_limit = int(min(max(2 * need + (4 << 20), 32 << 20), cap - (2 << 20)))

    flops = 2 * N * k1 * d + 4 * N * (d + k1)
    bytes_accessed = (N * (d + k1) + sum(int(p.size) for p in Pnexts)) * itemsize \
                     + 4 * num_layers

    kernel = _make_fused_kernel(N=N, tn=tn, num_layers=num_layers, mask_rows=mask_rows)

    wcss = pl.pallas_call(
        kernel,
        out_shape=jax.ShapeDtypeStruct((1, num_layers), jnp.float32),
        grid=(grid_n,),
        in_specs=in_specs,
        out_specs=out_specs,
        scratch_shapes=scratch_shapes,
        compiler_params=pltpu.CompilerParams(
            # TODO(synk): on v7x add a leading core-parallel axis over the 2 TensorCores.
            dimension_semantics=("arbitrary",),
            vmem_limit_bytes=vmem_limit),
        cost_estimate=pl.CostEstimate(flops=int(flops), transcendentals=0,
                                      bytes_accessed=int(bytes_accessed)),
    )(Xc, P1, *Pnexts)
    return wcss[0, :]


# --------------------------------------------------------------------------
# Module equivalent
# --------------------------------------------------------------------------
class ClusterLoss:
    """Hierarchical clustering loss (JAX / Pallas port of the PyTorch module)."""

    def __init__(self, block_n=None, input_dtype=jnp.float32):
        self.block_n = block_n
        self.input_dtype = input_dtype   # jnp.bfloat16 halves HBM traffic; f32 accumulation.

    def __call__(self, Lamb, Attributes, Probabilities, Cluster_labels):
        L = len(Cluster_labels)
        X = jnp.asarray(Attributes)
        Ps = [jnp.asarray(p) for p in Probabilities[:L]]

        # Host-side cluster-count check (mirrors len(torch.unique(labels)) in the reference).
        for idx, labels in enumerate(Cluster_labels):
            n_clusters = int(np.unique(np.asarray(labels)).size)
            assert n_clusters == Ps[idx].shape[1], (idx, n_clusters, Ps[idx].shape)

        wcss_vec = hierarchical_wcss(X, Ps, block_n=self.block_n,
                                     input_dtype=self.input_dtype)          # (L,)
        lam = jnp.asarray([float(v) for v in Lamb[:L]], dtype=jnp.float32)
        loss = jnp.sum(lam * wcss_vec, keepdims=True)                        # shape (1,)

        # Single device->host transfer for the python-float loss_list (reference parity).
        host = np.asarray(jax.device_get(wcss_vec))
        loss_list = [float(Lamb[i]) * float(host[i]) for i in range(L)]
        return loss, loss_list


# --------------------------------------------------------------------------
# Pure-JAX reference (for correctness check)
# --------------------------------------------------------------------------
def _ref_wcss(X, Plist):
    P = Plist[0]
    for nxt in Plist[1:]:
        P = P @ nxt
    col = P.sum(axis=0, keepdims=True)
    C = (P.T @ X) / col.T
    d2 = (jnp.sum(X * X, 1, keepdims=True)
          - 2.0 * (X @ C.T)
          + jnp.sum(C * C, 1, keepdims=True).T)
    return jnp.sum(P * d2)


def _ref_loss(Lamb, X, Probabilities):
    total = 0.0
    for idx in range(len(Probabilities)):
        total += Lamb[idx] * float(_ref_wcss(X, list(Probabilities[:idx + 1])))
    return total


# --------------------------------------------------------------------------
if __name__ == "__main__":
    key = jax.random.PRNGKey(0)
    k_x, k_p1, k_p2 = jax.random.split(key, 3)

    N, d = 20, 32          # nodes, feature dim (N deliberately NOT a multiple of 8)
    k1, k2 = 8, 4          # clusters at hierarchy layers 1 and 2

    Attributes = jax.random.normal(k_x, (N, d), dtype=jnp.float32)
    P1 = jax.nn.softmax(jax.random.normal(k_p1, (N, k1), dtype=jnp.float32), axis=-1)
    P2 = jax.nn.softmax(jax.random.normal(k_p2, (k1, k2), dtype=jnp.float32), axis=-1)
    Probabilities = [P1, P2]
    Cluster_labels = [np.arange(N) % k1, np.arange(N) % k2]
    Lamb = [1.0, 0.5]

    ref = _ref_loss(Lamb, Attributes, Probabilities)
    tol = 1e-3 * max(1.0, abs(ref))

    # 1) f32 inputs, forced tiny tile: exercises the multi-step streaming reduction and
    #    the masked remainder tile (20 % 8 != 0).
    loss, loss_list = ClusterLoss(block_n=8)(Lamb, Attributes, Probabilities, Cluster_labels)
    loss = jax.block_until_ready(loss)
    assert abs(float(loss[0]) - ref) <= tol, (float(loss[0]), ref)
    assert abs(sum(loss_list) - ref) <= tol, (sum(loss_list), ref)

    # 2) default VMEM-budget-derived tile (single full-array tile at this small N).
    loss_d, _ = ClusterLoss()(Lamb, Attributes, Probabilities, Cluster_labels)
    loss_d = jax.block_until_ready(loss_d)
    assert abs(float(loss_d[0]) - ref) <= tol, (float(loss_d[0]), ref)

    # 3) bf16-streamed inputs (f32 accumulation), checked against a reference evaluated
    #    on the same bf16-rounded inputs.
    loss_bf, _ = ClusterLoss(block_n=16, input_dtype=jnp.bfloat16)(
        Lamb, Attributes, Probabilities, Cluster_labels)
    loss_bf = jax.block_until_ready(loss_bf)
    Xr = Attributes.astype(jnp.bfloat16).astype(jnp.float32)
    Pr = [p.astype(jnp.bfloat16).astype(jnp.float32) for p in Probabilities]
    ref_bf = _ref_loss(Lamb, Xr, Pr)
    tol_bf = 5e-3 * max(1.0, abs(ref_bf))
    assert abs(float(loss_bf[0]) - ref_bf) <= tol_bf, (float(loss_bf[0]), ref_bf)

    print("KERNEL_OK")
</pallas_src>

<mosaic_0001>
module attributes {stable_mosaic.version = 11 : i64} {
  func.func @kernel(%arg0: i32, %arg1: memref<8x32xf32, #tpu.memory_space<vmem>>, %arg2: memref<8x8xf32, #tpu.memory_space<vmem>>, %arg3: memref<8x4xf32, #tpu.memory_space<vmem>>, %arg4: memref<1x2xf32, #tpu.memory_space<vmem>>, %arg5: memref<1x8xf32, #tpu.memory_space<vmem>>, %arg6: memref<8x32xf32, #tpu.memory_space<vmem>>, %arg7: memref<1x8xf32, #tpu.memory_space<vmem>>) attributes {dimension_semantics = [#tpu.dimension_semantics<arbitrary>], iteration_bounds = array<i64: 3>, scalar_prefetch = 0 : i64, scratch_operands = 3 : i64, tpu.core_type = #tpu.core_type<tc>, window_params = [{transform_indices = @transform_0, window_bounds = array<i64: 8, 32>}, {transform_indices = @transform_1, window_bounds = array<i64: 8, 8>}, {pipeline_mode = #tpu.pipeline_mode<synchronous>, transform_indices = @transform_2, window_bounds = array<i64: 8, 4>}, {pipeline_mode = #tpu.pipeline_mode<synchronous>, transform_indices = @transform_3, window_bounds = array<i64: 1, 2>}]} {
    %c0_i32 = arith.constant 0 : i32
    %0 = arith.cmpi eq, %arg0, %c0_i32 : i32
    %1 = arith.extui %0 : i1 to i32
    %c0_i32_0 = arith.constant 0 : i32
    %2 = arith.cmpi ne, %1, %c0_i32_0 : i32
    scf.if %2 {
      %cst_22 = arith.constant 0.000000e+00 : f32
      %43 = vector.broadcast %cst_22 : f32 to vector<1x8xf32>
      %c0_23 = arith.constant 0 : index
      %c0_24 = arith.constant 0 : index
      %44 = vector.load %arg5[%c0_23, %c0_24] : memref<1x8xf32, #tpu.memory_space<vmem>>, vector<1x8xf32>
      tpu.vector_store %arg5[%c0_23, %c0_24], %43 {strides = array<i32>} : memref<1x8xf32, #tpu.memory_space<vmem>>, vector<1x8xf32>,
      %cst_25 = arith.constant 0.000000e+00 : f32
      %45 = vector.broadcast %cst_25 : f32 to vector<8x32xf32>
      %c0_26 = arith.constant 0 : index
      %c0_27 = arith.constant 0 : index
      %46 = vector.load %arg6[%c0_26, %c0_27] : memref<8x32xf32, #tpu.memory_space<vmem>>, vector<8x32xf32>
      tpu.vector_store %arg6[%c0_26, %c0_27], %45 {strides = array<i32>} : memref<8x32xf32, #tpu.memory_space<vmem>>, vector<8x32xf32>,
      %cst_28 = arith.constant 0.000000e+00 : f32
      %47 = vector.broadcast %cst_28 : f32 to vector<1x8xf32>
      %c0_29 = arith.constant 0 : index
      %c0_30 = arith.constant 0 : index
      %48 = vector.load %arg7[%c0_29, %c0_30] : memref<1x8xf32, #tpu.memory_space<vmem>>, vector<1x8xf32>
      tpu.vector_store %arg7[%c0_29, %c0_30], %47 {strides = array<i32>} : memref<1x8xf32, #tpu.memory_space<vmem>>, vector<1x8xf32>,
    } else {
    }
    %c0 = arith.constant 0 : index
    %c0_1 = arith.constant 0 : index
    %3 = vector.load %arg1[%c0, %c0_1] : memref<8x32xf32, #tpu.memory_space<vmem>>, vector<8x32xf32>
    %c0_2 = arith.constant 0 : index
    %c0_3 = arith.constant 0 : index
    %4 = vector.load %arg2[%c0_2, %c0_3] : memref<8x8xf32, #tpu.memory_space<vmem>>, vector<8x8xf32>
    %c8_i32 = arith.constant 8 : i32
    %5 = arith.muli %arg0, %c8_i32 : i32
    %6 = tpu.iota {dimensions = array<i32: 0>} : vector<8x1xi32>
    %7 = vector.broadcast %5 : i32 to vector<8x1xi32>
    %8 = arith.addi %7, %6 : vector<8x1xi32>
    %c20_i32 = arith.constant 20 : i32
    %9 = vector.broadcast %c20_i32 : i32 to vector<8x1xi32>
    %10 = arith.cmpi slt, %8, %9 : vector<8x1xi32>
    %c0_i32_4 = arith.constant 0 : i32
    %11 = arith.sitofp %c0_i32_4 : i32 to f32
    %12 = vector.shape_cast %10 : vector<8x1xi1> to vector<8x1xi1>
    %13 = vector.broadcast %12 : vector<8x1xi1> to vector<8x32xi1>
    %14 = vector.broadcast %11 : f32 to vector<8x32xf32>
    %15 = arith.select %13, %3, %14 : vector<8x32xi1>, vector<8x32xf32>
    %c0_i32_5 = arith.constant 0 : i32
    %16 = arith.sitofp %c0_i32_5 : i32 to f32
    %17 = vector.shape_cast %10 : vector<8x1xi1> to vector<8x1xi1>
    %18 = vector.broadcast %17 : vector<8x1xi1> to vector<8x8xi1>
    %19 = vector.broadcast %16 : f32 to vector<8x8xf32>
    %20 = arith.select %18, %4, %19 : vector<8x8xi1>, vector<8x8xf32>
    %21 = arith.mulf %15, %15 : vector<8x32xf32>
    %cst = arith.constant dense<0.000000e+00> : vector<8xf32>
    %22 = vector.multi_reduction <add>, %21, %cst [1] : vector<8x32xf32> to vector<8xf32>
    %23 = vector.shape_cast %22 : vector<8xf32> to vector<8x1xf32>
    %c0_6 = arith.constant 0 : index
    %c0_7 = arith.constant 0 : index
    %24 = vector.load %arg5[%c0_6, %c0_7] : memref<1x8xf32, #tpu.memory_space<vmem>>, vector<1x8xf32>
    %cst_8 = arith.constant dense<0.000000e+00> : vector<8xf32>
    %25 = vector.multi_reduction <add>, %20, %cst_8 [0] : vector<8x8xf32> to vector<8xf32>
    %26 = vector.shape_cast %25 : vector<8xf32> to vector<1x8xf32>
    %27 = arith.addf %24, %26 : vector<1x8xf32>
    %c0_9 = arith.constant 0 : index
    %c0_10 = arith.constant 0 : index
    %28 = vector.load %arg5[%c0_9, %c0_10] : memref<1x8xf32, #tpu.memory_space<vmem>>, vector<1x8xf32>
    tpu.vector_store %arg5[%c0_9, %c0_10], %27 {strides = array<i32>} : memref<1x8xf32, #tpu.memory_space<vmem>>, vector<1x8xf32>,
    %c0_11 = arith.constant 0 : index
    %c0_12 = arith.constant 0 : index
    %29 = vector.load %arg7[%c0_11, %c0_12] : memref<1x8xf32, #tpu.memory_space<vmem>>, vector<1x8xf32>
    %30 = vector.broadcast %23 : vector<8x1xf32> to vector<8x8xf32>
    %31 = arith.mulf %20, %30 : vector<8x8xf32>
    %cst_13 = arith.constant dense<0.000000e+00> : vector<8xf32>
    %32 = vector.multi_reduction <add>, %31, %cst_13 [0] : vector<8x8xf32> to vector<8xf32>
    %33 = vector.shape_cast %32 : vector<8xf32> to vector<1x8xf32>
    %34 = arith.addf %29, %33 : vector<1x8xf32>
    %c0_14 = arith.constant 0 : index
    %c0_15 = arith.constant 0 : index
    %35 = vector.load %arg7[%c0_14, %c0_15] : memref<1x8xf32, #tpu.memory_space<vmem>>, vector<1x8xf32>
    tpu.vector_store %arg7[%c0_14, %c0_15], %34 {strides = array<i32>} : memref<1x8xf32, #tpu.memory_space<vmem>>, vector<1x8xf32>,
    %c0_16 = arith.constant 0 : index
    %c0_17 = arith.constant 0 : index
    %36 = vector.load %arg6[%c0_16, %c0_17] : memref<8x32xf32, #tpu.memory_space<vmem>>, vector<8x32xf32>
    %cst_18 = arith.constant dense<0.000000e+00> : vector<8x32xf32>
    %37 = tpu.matmul %20, %15, %cst_18 {dimension_numbers = #tpu.dot_dimension_numbers<[0], [0], [1], [1], [0, 1, 1, 1], [], []>} : vector<8x8xf32>, vector<8x32xf32>, vector<8x32xf32> -> vector<8x32xf32>
    %38 = arith.addf %36, %37 : vector<8x32xf32>
    %c0_19 = arith.constant 0 : index
    %c0_20 = arith.constant 0 : index
    %39 = vector.load %arg6[%c0_19, %c0_20] : memref<8x32xf32, #tpu.memory_space<vmem>>, vector<8x32xf32>
    tpu.vector_store %arg6[%c0_19, %c0_20], %38 {strides = array<i32>} : memref<8x32xf32, #tpu.memory_space<vmem>>, vector<8x32xf32>,
    %c2_i32 = arith.constant 2 : i32
    %40 = arith.cmpi eq, %arg0, %c2_i32 : i32
    %41 = arith.extui %40 : i1 to i32
    %c0_i32_21 = arith.constant 0 : i32
    %42 = arith.cmpi ne, %41, %c0_i32_21 : i32
    scf.if %42 {
      %c0_22 = arith.constant 0 : index
      %c0_23 = arith.constant 0 : index
      %43 = vector.load %arg5[%c0_22, %c0_23] : memref<1x8xf32, #tpu.memory_space<vmem>>, vector<1x8xf32>
      %c0_24 = arith.constant 0 : index
      %c0_25 = arith.constant 0 : index
      %44 = vector.load %arg6[%c0_24, %c0_25] : memref<8x32xf32, #tpu.memory_space<vmem>>, vector<8x32xf32>
      %c0_26 = arith.constant 0 : index
      %c0_27 = arith.constant 0 : index
      %45 = vector.load %arg7[%c0_26, %c0_27] : memref<1x8xf32, #tpu.memory_space<vmem>>, vector<1x8xf32>
      %cst_28 = arith.constant 9.99999996E-13 : f32
      %46 = vector.broadcast %cst_28 : f32 to vector<1x8xf32>
      %47 = arith.maximumf %43, %46 : vector<1x8xf32>
      %48 = tpu.reciprocal %47 : vector<1x8xf32> -> vector<1x8xf32>
      %49 = arith.mulf %44, %44 : vector<8x32xf32>
      %cst_29 = arith.constant dense<0.000000e+00> : vector<8xf32>
      %50 = vector.multi_reduction <add>, %49, %cst_29 [1] : vector<8x32xf32> to vector<8xf32>
      %51 = vector.shape_cast %50 : vector<8xf32> to vector<8x1xf32>
      %52 = tpu.transpose %48, [1, 0] : vector<1x8xf32> -> vector<8x1xf32>
      %53 = arith.mulf %51, %52 : vector<8x1xf32>
      %54 = vector.shape_cast %53 : vector<8x1xf32> to vector<1x8x1xf32>
      %cst_30 = arith.constant dense<0.000000e+00> : vector<1xf32>
      %55 = vector.multi_reduction <add>, %54, %cst_30 [1, 2] : vector<1x8x1xf32> to vector<1xf32>
      %56 = vector.shape_cast %55 : vector<1xf32> to vector<1x1x1xf32>
      %57 = vector.extract %56[0, 0, 0] : f32 from vector<1x1x1xf32>
      %58 = vector.broadcast %57 : f32 to vector<1x1xf32>
      %59 = vector.shape_cast %45 : vector<1x8xf32> to vector<1x1x8xf32>
      %cst_31 = arith.constant dense<0.000000e+00> : vector<1xf32>
      %60 = vector.multi_reduction <add>, %59, %cst_31 [1, 2] : vector<1x1x8xf32> to vector<1xf32>
      %61 = vector.shape_cast %60 : vector<1xf32> to vector<1x1x1xf32>
      %62 = vector.extract %61[0, 0, 0] : f32 from vector<1x1x1xf32>
      %63 = vector.broadcast %62 : f32 to vector<1x1xf32>
      %64 = arith.subf %63, %58 : vector<1x1xf32>
      %cst_32 = arith.constant 0.000000e+00 : f32
      %65 = vector.broadcast %cst_32 : f32 to vector<1x1xf32>
      %66 = arith.maximumf %64, %65 : vector<1x1xf32>
      %c0_33 = arith.constant 0 : index
      %c0_34 = arith.constant 0 : index
      %67 = vector.load %arg3[%c0_33, %c0_34] : memref<8x4xf32, #tpu.memory_space<vmem>>, vector<8x4xf32>
      %cst_35 = arith.constant dense<0.000000e+00> : vector<1x4xf32>
      %68 = tpu.matmul %43, %67, %cst_35 {dimension_numbers = #tpu.dot_dimension_numbers<[1], [0], [0], [1], [0, 0, 1, 1], [], []>} : vector<1x8xf32>, vector<8x4xf32>, vector<1x4xf32> -> vector<1x4xf32>
      %cst_36 = arith.constant dense<0.000000e+00> : vector<1x4xf32>
      %69 = tpu.matmul %45, %67, %cst_36 {dimension_numbers = #tpu.dot_dimension_numbers<[1], [0], [0], [1], [0, 0, 1, 1], [], []>} : vector<1x8xf32>, vector<8x4xf32>, vector<1x4xf32> -> vector<1x4xf32>
      %cst_37 = arith.constant dense<0.000000e+00> : vector<4x32xf32>
      %70 = tpu.matmul %67, %44, %cst_37 {dimension_numbers = #tpu.dot_dimension_numbers<[0], [0], [1], [1], [0, 1, 1, 1], [], []>} : vector<8x4xf32>, vector<8x32xf32>, vector<4x32xf32> -> vector<4x32xf32>
      %cst_38 = arith.constant 9.99999996E-13 : f32
      %71 = vector.broadcast %cst_38 : f32 to vector<1x4xf32>
      %72 = arith.maximumf %68, %71 : vector<1x4xf32>
      %73 = tpu.reciprocal %72 : vector<1x4xf32> -> vector<1x4xf32>
      %74 = arith.mulf %70, %70 : vector<4x32xf32>
      %cst_39 = arith.constant dense<0.000000e+00> : vector<4xf32>
      %75 = vector.multi_reduction <add>, %74, %cst_39 [1] : vector<4x32xf32> to vector<4xf32>
      %76 = vector.shape_cast %75 : vector<4xf32> to vector<4x1xf32>
      %77 = tpu.transpose %73, [1, 0] : vector<1x4xf32> -> vector<4x1xf32>
      %78 = arith.mulf %76, %77 : vector<4x1xf32>
      %79 = vector.shape_cast %78 : vector<4x1xf32> to vector<1x4x1xf32>
      %cst_40 = arith.constant dense<0.000000e+00> : vector<1xf32>
      %80 = vector.multi_reduction <add>, %79, %cst_40 [1, 2] : vector<1x4x1xf32> to vector<1xf32>
      %81 = vector.shape_cast %80 : vector<1xf32> to vector<1x1x1xf32>
      %82 = vector.extract %81[0, 0, 0] : f32 from vector<1x1x1xf32>
      %83 = vector.broadcast %82 : f32 to vector<1x1xf32>
      %84 = vector.shape_cast %69 : vector<1x4xf32> to vector<1x1x4xf32>
      %cst_41 = arith.constant dense<0.000000e+00> : vector<1xf32>
      %85 = vector.multi_reduction <add>, %84, %cst_41 [1, 2] : vector<1x1x4xf32> to vector<1xf32>
      %86 = vector.shape_cast %85 : vector<1xf32> to vector<1x1x1xf32>
      %87 = vector.extract %86[0, 0, 0] : f32 from vector<1x1x1xf32>
      %88 = vector.broadcast %87 : f32 to vector<1x1xf32>
      %89 = arith.subf %88, %83 : vector<1x1xf32>
      %cst_42 = arith.constant 0.000000e+00 : f32
      %90 = vector.broadcast %cst_42 : f32 to vector<1x1xf32>
      %91 = arith.maximumf %89, %90 : vector<1x1xf32>
      %92 = tpu.concatenate %66, %91 in 1 : vector<1x1xf32>, vector<1x1xf32> -> vector<1x2xf32>
      %c0_43 = arith.constant 0 : index
      %c0_44 = arith.constant 0 : index
      %93 = vector.load %arg4[%c0_43, %c0_44] : memref<1x2xf32, #tpu.memory_space<vmem>>, vector<1x2xf32>
      tpu.vector_store %arg4[%c0_43, %c0_44], %92 {strides = array<i32>} : memref<1x2xf32, #tpu.memory_space<vmem>>, vector<1x2xf32>,
    } else {
    }
    return
  }
  func.func @transform_0(%arg0: i32) -> (i32, i32) {
    %c0_i32 = arith.constant 0 : i32
    %c0_i32_0 = arith.constant 0 : i32
    return %arg0, %c0_i32 : i32, i32
  }
  func.func @transform_1(%arg0: i32) -> (i32, i32) {
    %c0_i32 = arith.constant 0 : i32
    %c0_i32_0 = arith.constant 0 : i32
    return %arg0, %c0_i32 : i32, i32
  }
  func.func @transform_2(%arg0: i32) -> (i32, i32) {
    %c0_i32 = arith.constant 0 : i32
    %c0_i32_0 = arith.constant 0 : i32
    %c0_i32_1 = arith.constant 0 : i32
    return %c0_i32, %c0_i32_0 : i32, i32
  }
  func.func @transform_3(%arg0: i32) -> (i32, i32) {
    %c0_i32 = arith.constant 0 : i32
    %c0_i32_0 = arith.constant 0 : i32
    %c0_i32_1 = arith.constant 0 : i32
    return %c0_i32, %c0_i32_0 : i32, i32
  }
}

</mosaic_0001>

<bundles_post_ra>
// kernel: tpu_custom_call.1
= control target key start
LH: loop header
LB: loop body
LE: loop exit
PB: predicated region body
PF: predicated region fallthrough
CT: control target
= control target key end

     0   :  { %8 = vsyncpa [#allocation6], 0  ;;  %s920_s12 = smov 0   ;;  %s987_s0 = inlined_call_operand.vmem [shape: f32[20,32], index: 0, kind: input, shape index: {}]   ;;  %s988_s1 = inlined_call_operand.vmem [shape: f32[20,8], index: 1, kind: input, shape index: {}]   ;;  %s989_s2 = inlined_call_operand.vmem [shape: f32[8,4], index: 2, kind: input, shape index: {}]   ;;  %s990_s3 = inlined_call_operand.hbm [shape: f32[1,2], index: 3, kind: output, shape index: {}]  }
   0x1 LB: > { %s926_s13 = sadd.s32 4294967295, %s892_s12   ;;  %p781_p0 = scmp.ge.s32.totalorder %s892_s12, 1  ;;  %s892_s12 = sphi %s920_s12, %s14_s12  }
   0x2   : > { %p141_p1 = scmp.lt.s32.totalorder %s892_s12, 4 }
   0x4   : > { %p142_p2 = pnand %p781_p0, %p141_p1 }
   0x5   : > { %p163_p3 = scmp.lt.s32.totalorder (!%p142_p2), %s926_s13, 2  ;;  %p784_p4 = scmp.ne.s32.totalorder (!%p142_p2), %s926_s13, 0 }
   0x6   : > { %145 = sbr.rel (%p142_p2) target bundleno = 1023 (0x3ff), region = 32 }
   0xd   : > { %s164_s14 = scalar_select %p163_p3, %s926_s13, 2 }
   0xe   : > { %174 = sbr.rel (%p784_p4) target bundleno = 21 (0x15), region = 36  ;;  %vm175_vm0 = vcmask (!%p784_p4), 57344   ;;  %vm177_vm1 = vcmask (!%p784_p4), 261120   ;;  %v894_v0 = vmov (!%p784_p4), 0.0  }
   0xf   : > { %s782_s15 = sshll.u32 %s164_s14, 3  ;;  %176 = vst.msk [vmem:[#allocation2] sm:$0x1] (!%p784_p4), %vm175_vm0, %v894_v0  ;;  %179 = vst.msk [vmem:[#allocation4] sm:$0x1] (!%p784_p4), %vm175_vm0, %v894_v0 }
  0x10   : > { %s166_s18 = scalar_lea.vmem %s987_s0, %s782_s15  ;;  %s170_s21 = scalar_lea.vmem %s988_s1, %s782_s15  ;;  %178 = vst.msk [vmem:[#allocation3] sm:$0xff] (!%p784_p4), %vm177_vm1, %v894_v0 }
  0x15 PF: > { %s785_s22 = sshll.u32 %s926_s13, 3  ;;  %v183_v1 = vlaneseq  ;;  %v895_v3 = vmov 0.0   ;;  %vm896_vm2 = vmmov 0   ;;  %v181_v5 = vld [vmem:[%s170_s21] sm:$0xff]  ;;  %vm198_vm4 = vcmask 64512   ;;  %p788_p5 = scmp.ne.s32.totalorder %s926_s13, 2 }
  0x16   : > { %v185_v2 = vstv %s785_s22  ;;  %804 = vmatprep.subr.mxu0 %v895_v3  ;;  %806 = vmatprep.mubr.msk.f32.mxu0 %vm896_vm2, %v895_v3  ;;  %v180_v8 = vld [vmem:[%s166_s18] sm:$0xff]  ;;  %vm207_vm5 = vcmask 57344   ;;  %vm193_vm6 = vcmask 261120   ;;  %v209_v30 = vld [vmem:[#allocation4] sm:$0x1]  ;;  %v897_v39 = vmov (!%p788_p5), 0.0  }
  0x17   : > { %v184_v4 = vshrl.u32 %v183_v1, 7  ;;  %v197_v15 = vld [vmem:[#allocation2] sm:$0x1]  ;;  %v220_v33 = vld [vmem:[#allocation3] sm:$0xff]  ;;  %vm898_vm7 = vmmov (!%p788_p5), 0   ;;  %814 = vmatprep.subr.mxu1 (!%p788_p5), %v897_v39  ;;  %vm654_vm8 = vcmask (!%p788_p5), 257024  }
  0x18   : > { %v399_v37 = vld [vmem:[%s989_s2] sm:$0xff] (!%p788_p5)  ;;  %816 = vmatprep.mubr.msk.f32.mxu1 (!%p788_p5), %vm898_vm7, %v897_v39  ;;  %vm374_vm9 = vcmask (!%p788_p5), 7168   ;;  %vm691_vm10 = vcmask (!%p788_p5), 3072   ;;  %vm703_vm11 = vcmask (!%p788_p5), 24576   ;;  %vm718_vm12 = vcmask (!%p788_p5), 8192  }
  0x19   : > { %v186_v6 = vadd.s32 %v185_v2, %v184_v4  ;;  %815 = vmatpush3.msra.mxu1 (!%p788_p5), %v399_v37 }
  0x1b   : > { %vm187_vm3 = vcmp.lt.s32.totalorder %v186_v6, 20 }
  0x1c   : > { %v191_v7 = vsel %vm187_vm3, %v181_v5, 0.0  ;;  %805 = vmatpush3.msk.msra.mxu0 %vm187_vm3, %v180_v8  ;;  %v190_v18 = vsel %vm187_vm3, %v180_v8, 0.0 }
  0x1d   : > { %221 = vxpose.xlu0.b32.start.end [1/1] (short) (narrow) %v191_v7, 8  ;;  %v199_v9 = vsel %vm198_vm4, %v191_v7, 0.0  ;;  %v192_v19 = vmul.f32 %v190_v18, %v190_v18  ;;  %809 = vmatprep.subr.mxu0 (!%p788_p5), %v897_v39 }
  0x1e   : > { %v200_v10 = vrot.slane %v199_v9, 4 }
  0x1f   : > { %v194_v20 = vsel %vm193_vm6, %v192_v19, 0.0 }
  0x20   : > { %v201_v11 = vadd.f32 %v200_v10, %v199_v9 }
  0x22   : > { %v202_v12 = vrot.slane %v201_v11, 2 }
  0x24   : > { %v203_v13 = vadd.f32 %v202_v12, %v201_v11 }
  0x26   : > { %v204_v14 = vrot.slane %v203_v13, 1 }
  0x28   : > { %v205_v16 = vadd.f32 %v204_v14, %v203_v13 }
  0x2a   : > { %v206_v17 = vadd.f32 %v205_v16, %v197_v15 }
  0x2c   : > { %208 = vst.msk [vmem:[#allocation2] sm:$0x1] %vm207_vm5, %v206_v17 }
  0x33   : > { %v332_v38 = vld [vmem:[#allocation2] sm:$0x1] (!%p788_p5) }
  0x34   : > { %v335_v53 = vmax.f32 (!%p788_p5), %v332_v38, 1e-12 }
  0x4a   : > { %195 = vadd.xlane.f32.xlu0 %v194_v20 }
  0x77   : > { %546 = vxpose.xlu0.b32.start.end [1/1] (short) (narrow) (!%p788_p5), %v399_v37, 8 }
  0x9d   : > { %v237_v21 = vpop.trf.xlu0 }
  0x9e   : > { %807 = vmatmul.mubr.msk.f32.vlgmr.msra.gmra.mrb[0].mxu0 %vm198_vm4, %v237_v21 }
  0x9f   : > { %810 = vmatpush3.msra.mxu0 (!%p788_p5), %v399_v37  ;;  %811 = vmatprep.mubr.msk.f32.mxu0 (!%p788_p5), %vm898_vm7, %v897_v39 }
  0xa0   : > { %819 = vmatprep.subr.mxu0 (!%p788_p5), %v897_v39 }
  0xd7   : > { %v196_v22 = vpop.xlane.xlu0 %195 }
  0xd8   : > { %v210_v23 = vmul.f32 %v196_v22, %v191_v7 }
  0xda   : > { %v211_v24 = vsel %vm198_vm4, %v210_v23, 0.0 }
  0xdb   : > { %v212_v25 = vrot.slane %v211_v24, 4 }
  0xdd   : > { %v213_v26 = vadd.f32 %v212_v25, %v211_v24 }
  0xdf   : > { %v214_v27 = vrot.slane %v213_v26, 2 }
  0xe1   : > { %v215_v28 = vadd.f32 %v214_v27, %v213_v26 }
  0xe3   : > { %v216_v29 = vrot.slane %v215_v28, 1 }
  0xe5   : > { %v217_v31 = vadd.f32 %v216_v29, %v215_v28 }
  0xe7   : > { %v218_v32 = vadd.f32 %v217_v31, %v209_v30 }
  0xe9   : > { %219 = vst.msk [vmem:[#allocation4] sm:$0x1] %vm207_vm5, %v218_v32 }
  0xf0   : > { %v334_v41 = vld [vmem:[#allocation4] sm:$0x1] (!%p788_p5) }
  0xf1   : > { %817 = vmatmul.mubr.msk.f32.vlgmr.msra.gmra.mrb[0].mxu1 (!%p788_p5), %vm198_vm4, %v334_v41  ;;  %v386_v55 = vsel (!%p788_p5), %vm207_vm5, %v334_v41, 0.0 }
  0xf7   : > { %v562_v44 = vpop.trf.xlu0 (!%p788_p5) }
 0x16e   : > { %331 = sbr.rel (%p788_p5) target bundleno = 998 (0x3e6), region = 40 }
 0x171   : > { %v322_v34 = vpop.f32.mrb[0].mxu0 }
 0x172   : > { %v326_v35 = vadd.f32 %v322_v34, %v220_v33  ;;  %v808_v36 = vpop.f32.mrb[1].mxu0  ;;  %812 = vmatmul.mubr.msk.f32.vlgmr.msra.gmra.mrb[0].mxu0 (!%p788_p5), %vm198_vm4, %v332_v38 }
 0x173   : > { %821 = vmatprep.mubr.msk.f32.mxu0 (!%p788_p5), %vm898_vm7, %v897_v39 }
 0x174   : > { %327 = vst.msk [vmem:[#allocation3] sm:$0xff] %vm193_vm6, %v326_v35 }
 0x17b   : > { %v333_v40 = vld [vmem:[#allocation3] sm:$0xff] }
 0x17c   : > { %820 = vmatpush3.msra.mxu0 %v333_v40  ;;  %v337_v42 = vmul.f32 %v333_v40, %v333_v40 }
 0x17d   : > { %822 = vmatmul.mubr.msk.f32.vlgmr.msra.gmra.mrb[2].mxu0 %vm198_vm4, %v562_v44 }
 0x17e   : > { %v338_v43 = vsel %vm193_vm6, %v337_v42, 0.0 }
 0x17f   : > { %339 = vadd.xlane.f32.xlu0 %v338_v43 }
 0x1c4   : > { %v542_v56 = vpop.f32.mrb[0].mxu1 }
 0x1c5   : > { %v818_v57 = vpop.f32.mrb[1].mxu1  ;;  %v704_v2 = vsel %vm703_vm11, %v542_v56, 0.0 }
 0x20c   : > { %v340_v58 = vpop.xlane.xlu0 %339 }
 0x245   : > { %v469_v45 = vpop.f32.mrb[0].mxu0 }
 0x246   : > { %v651_v46 = vmax.f32 %v469_v45, 1e-12  ;;  %v813_v47 = vpop.f32.mrb[1].mxu0 }
 0x248   : > { %852 = vrcp.f32 %v651_v46 }
 0x249   : > { %854 = vrcp.f32 %v335_v53 }
 0x250   : > { %v647_v49 = vpop.f32.mrb[2].mxu0 }
 0x251   : > { %v653_v50 = vmul.f32 %v647_v49, %v647_v49  ;;  %v823_v51 = vpop.f32.mrb[3].mxu0 }
 0x252   : > { %v853_v48 = vpop.eup %852 }
 0x253   : > { %658 = vxpose.xlu0.b32.start.end [1/1] (short) (narrow) %v853_v48, 8  ;;  %v655_v52 = vsel %vm654_vm8, %v653_v50, 0.0  ;;  %v855_v54 = vpop.eup %854 }
 0x254   : > { %656 = vadd.xlane.f32.xlu1 %v655_v52 }
 0x280   : > { %387 = vadd.xlane.f32.xlu0 %v386_v55 }
 0x287   : > { %341 = vxpose.xlu1.b32.start.end [1/1] (short) (narrow) %v855_v54, 8 }
 0x2d3   : > { %v674_v60 = vpop.trf.xlu0 }
 0x2e1   : > { %v657_v59 = vpop.xlane.xlu1 %656 }
 0x2e2   : > { %v690_v63 = vmul.f32 %v674_v60, %v657_v59 }
 0x2e4   : > { %v692_v1 = vsel %vm691_vm10, %v690_v63, 0.0 }
 0x307   : > { %v357_v61 = vpop.trf.xlu1 }
 0x308   : > { %v373_v62 = vmul.f32 %v357_v61, %v340_v58 }
 0x30a   : > { %v375_v0 = vsel %vm374_vm9, %v373_v62, 0.0 }
 0x30b   : > { %376 = vadd.xlane.f32.xlu1 %v375_v0 }
 0x30d   : > { %v388_v3 = vpop.xlane.xlu0 %387 }
 0x30e   : > { %v389_v4 = vrot.slane %v388_v3, 4 }
 0x30f   : > { %693 = vadd.xlane.f32.xlu1 %v692_v1 }
 0x310   : > { %v390_v5 = vadd.f32 %v389_v4, %v388_v3 }
 0x312   : > { %v391_v6 = vrot.slane %v390_v5, 2 }
 0x313   : > { %705 = vadd.xlane.f32.xlu1 %v704_v2 }
 0x314   : > { %v392_v9 = vadd.f32 %v391_v6, %v390_v5 }
 0x316   : > { %v393_v14 = vrot.slane %v392_v9, 1 }
 0x318   : > { %v394_v21 = vadd.f32 %v393_v14, %v392_v9 }
 0x398   : > { %v377_v7 = vpop.xlane.xlu1 %376 }
 0x399   : > { %v378_v8 = vrot.slane %v377_v7, 4 }
 0x39b   : > { %v379_v10 = vadd.f32 %v378_v8, %v377_v7 }
 0x39c   : > { %v694_v11 = vpop.xlane.xlu1 %693 }
 0x39d   : > { %v380_v12 = vrot.slane %v379_v10, 2  ;;  %v695_v13 = vrot.slane %v694_v11, 4 }
 0x39f   : > { %v696_v15 = vadd.f32 %v695_v13, %v694_v11  ;;  %v381_v16 = vadd.f32 %v380_v12, %v379_v10 }
 0x3a0   : > { %v706_v17 = vpop.xlane.xlu1 %705 }
 0x3a1   : > { %v697_v18 = vrot.slane %v696_v15, 2  ;;  %v707_v19 = vrot.slane %v706_v17, 4  ;;  %v382_v20 = vrot.slane %v381_v16, 1 }
 0x3a3   : > { %v708_v22 = vadd.f32 %v707_v19, %v706_v17  ;;  %v383_v23 = vadd.f32 %v382_v20, %v381_v16  ;;  %v698_v24 = vadd.f32 %v697_v18, %v696_v15 }
 0x3a5   : > { %v709_v25 = vrot.slane %v708_v22, 2  ;;  %824 = vpush %v383_v23  ;;  %v699_v26 = vrot.slane %v698_v24, 1 }
 0x3a6   : > { %826 = vpush %v394_v21 }
 0x3a7   : > { %v710_v27 = vadd.f32 %v709_v25, %v708_v22  ;;  %v700_v28 = vadd.f32 %v699_v26, %v698_v24 }
 0x3a9   : > { %828 = vpush %v700_v28  ;;  %v711_v29 = vrot.slane %v710_v27, 1 }
 0x3ab   : > { %v712_v30 = vadd.f32 %v711_v29, %v710_v27 }
 0x3ad   : > { %830 = vpush %v712_v30 }
 0x3d6   : > { %s825_s25 = spop %824 }
 0x3d7   : > { %s827_s26 = spop %826  ;;  %v385_v31 = vstv %s825_s25 }
 0x3d8   : > { %v396_v32 = vstv %s827_s26 }
 0x3d9   : > { %v397_v33 = vsub.f32 %v396_v32, %v385_v31 }
 0x3da   : > { %s829_s27 = spop %828 }
 0x3db   : > { %v702_v34 = vstv %s829_s27  ;;  %v398_v37 = vmax.f32 %v397_v33, 0.0 }
 0x3de   : > { %s831_s28 = spop %830 }
 0x3df   : > { %v714_v35 = vstv %s831_s28 }
 0x3e0   : > { %v715_v36 = vsub.f32 %v714_v35, %v702_v34 }
 0x3e2   : > { %v716_v38 = vmax.f32 %v715_v36, 0.0 }
 0x3e4   : > { %v717_v39 = vsel %vm374_vm9, %v398_v37, %v716_v38 }
 0x3e5   : > { %719 = vst.msk [vmem:[#allocation5] sm:$0x1] %vm718_vm12, %v717_v39 }
 0x3e6 PF: > { %p836_p6 = scmp.eq.s32.totalorder %s926_s13, 2  ;;  %s899_s29 = smov [#allocation5]  }
 0x3e7   : > { %s727_s30 = sshll.u32 %s899_s29, 4  ;;  %s728_s30 = int_to_ptr.vmem [resolvable:$true] %s727_s30 }
 0x3e8   : > { %s856_s4 = scalar_lea.vmem %s728_s30, 16  ;;  %s862_s5 = scalar_lea.vmem %s728_s30, 32 }
 0x3e9   : > { %p857_p7 = scmp.ne.s32.totalorder %s728_s30, %s856_s4  ;;  %p863_p10 = scmp.lt.s32.totalorder %s728_s30, %s728_s30 }
 0x3ea   : > { %p864_p11 = scmp.lt.s32.totalorder %s862_s5, %s856_s4 }
 0x3eb   : > { %p858_p8 = pnand %p857_p7, %p836_p6 }
 0x3ec   : > { %p865_p12 = por %p864_p11, %p863_p10 }
 0x3ed   : > { %p859_p9 = pneg %p858_p8 }
 0x3ef   : > { %p866_p13 = pnand %p865_p12, %p859_p9 }
 0x3f1   : > { %869 = shalt.err (!%p866_p13)
}
 0x3f2   : > { %s870_s8 = scalar_lea.hbm %s990_s3, 16 }
 0x3f3   : > { %p871_p0 = scmp.ne.s32.totalorder %s990_s3, %s870_s8  ;;  %p876_p3 = scmp.lt.u32.totalorder %s870_s8, %s990_s3 }
 0x3f5   : > { %p872_p1 = pnand %p871_p0, %p836_p6 }
 0x3f7   : > { %p873_p2 = pneg %p872_p1 }
 0x3f9   : > { %p878_p4 = pnand %p876_p3, %p873_p2 }
 0x3fb   : > { %881 = shalt.err (!%p878_p4)
}
 0x3fc   : > { %833 = dma.vmem_to_hbm [thread:$0]  (%p836_p6), %s728_s30, 16, %s990_s3, [#allocation6]  }
 0x3fd   : > { %887 = dma.done.wait (%p836_p6), [#allocation6], 16  }
 0x3fe   : > { %889 = vsyncadd (%p836_p6), [#allocation6], 4294967280 }
 0x3ff PF: > { %s14_s12 = sadd.s32 1, %s892_s12  }
 0x400   : > { %p11_p5 = scmp.ge.s32.totalorder %s14_s12, 5  }
 0x402   :  { %13 = sbr.rel (!%p11_p5) target bundleno = 1 (0x1), region = 70 }
 0x409   :  { %740 = vsyncpa [#allocation6], 1 }
 0x40a   :  { %742 = vsyncpa [#allocation6 + $0x1], 1 }

</bundles_post_ra>
